<compile_context>
chip_gen: v7x
topology: tpu7x:2x2x1
jax: 0.10.0
libtpu: 0.0.40
codegen_flags: <defaults>
</compile_context>

<pallas_src>
import functools

import jax
import jax.numpy as jnp
from jax.experimental import pallas as pl
from jax.experimental.pallas import tpu as pltpu


def _soft_ce_kernel(x_ref, t_ref, out_ref, acc_ref, *,
                    total_rows, tile_rows, tiles_per_split):
    s = pl.program_id(0)   # split (parallel) axis — one per TensorCore on v7x
    j = pl.program_id(1)   # row-tile (reduction) axis

    @pl.when(j == 0)
    def _init():
        acc_ref[...] = jnp.zeros_like(acc_ref)

    # Logical (unclamped) tile handled by this grid point; used only for masking.
    # (The DMA index_map clamps, so duplicated/partial tiles are masked to zero.)
    row_start = (s * tiles_per_split + j) * tile_rows
    rows_left = total_rows - row_start
    row_ids = jax.lax.broadcasted_iota(jnp.int32, (tile_rows, 1), 0)
    valid = row_ids < rows_left

    zero = jnp.float32(0.0)
    x = jnp.where(valid, x_ref[...].astype(jnp.float32), zero)   # (TR, C)
    t = jnp.where(valid, t_ref[...].astype(jnp.float32), zero)   # (TR, C)

    # Numerically stable log-softmax pieces along the class (lane) axis.
    m = jnp.max(x, axis=-1, keepdims=True)
    shifted = x - m
    lse = jnp.log(jnp.sum(jnp.exp(shifted), axis=-1, keepdims=True))

    # -t * log_softmax(x) == t * (lse - shifted); masked rows contribute exactly 0.
    contrib = t * (lse - shifted)                                # (TR, C) f32

    # Lane-dense accumulation: fold row groups of 8 into the (8, C) scratch.
    n_classes = acc_ref.shape[-1]
    acc_ref[...] += jnp.sum(
        contrib.reshape(tile_rows // 8, 8, n_classes), axis=0)

    @pl.when(j == pl.num_programs(1) - 1)
    def _finalize():
        out_ref[...] = acc_ref[...]


def _round_up(v, m):
    return ((v + m - 1) // m) * m


def soft_target_cross_entropy(x, target, *, tile_rows=None, num_splits=2,
                              target_block_bytes=2 * 1024 * 1024,
                              max_tile_rows=4096):
    """x, target: (N, C) logits / soft targets. Returns scalar f32 mean loss."""
    assert x.shape == target.shape and x.ndim == 2
    n, c = x.shape
    itemsize = max(jnp.dtype(x.dtype).itemsize, jnp.dtype(target.dtype).itemsize)

    # Pick the row-tile size: big enough to amortize per-grid-step overhead,
    # bounded by a VMEM-friendly per-block byte budget (fits all generations).
    if tile_rows is None:
        rows = target_block_bytes // max(1, c * itemsize)
        rows = max(8, min(int(rows), max_tile_rows))
    else:
        rows = int(tile_rows)
    rows = min(rows, _round_up(n, 8))       # no need for a block larger than N
    rows = max(8, (rows // 8) * 8)          # sublane alignment
    tile_rows = rows

    num_tiles = pl.cdiv(n, tile_rows)
    num_splits = max(1, min(int(num_splits), num_tiles))
    tiles_per_split = pl.cdiv(num_tiles, num_splits)

    def in_index_map(s, j):
        # Clamp so the DMA never targets a fully out-of-range block; the kernel
        # masks rows using the *unclamped* logical tile index, so any
        # duplicated tail tile contributes zero.
        return (jnp.minimum(s * tiles_per_split + j, num_tiles - 1), 0)

    kernel = functools.partial(
        _soft_ce_kernel,
        total_rows=n, tile_rows=tile_rows, tiles_per_split=tiles_per_split)

    partials = pl.pallas_call(
        kernel,
        out_shape=jax.ShapeDtypeStruct((num_splits * 8, c), jnp.float32),
        grid_spec=pltpu.PrefetchScalarGridSpec(
            num_scalar_prefetch=0,
            grid=(num_splits, tiles_per_split),
            in_specs=[
                pl.BlockSpec((tile_rows, c), in_index_map),
                pl.BlockSpec((tile_rows, c), in_index_map),
            ],
            out_specs=pl.BlockSpec((8, c), lambda s, j: (s, 0)),
            scratch_shapes=[pltpu.VMEM((8, c), jnp.float32)],
        ),
        compiler_params=pltpu.CompilerParams(
            # split axis across cores (v7x megacore); row-tile axis is a reduction
            dimension_semantics=("parallel", "arbitrary"),
            vmem_limit_bytes=40 * 1024 * 1024,
        ),
        cost_estimate=pl.CostEstimate(
            flops=8 * n * c,
            transcendentals=n * c,
            bytes_accessed=2 * n * c * itemsize + num_splits * 8 * c * 4,
        ),
    )(x, target)

    # Tiny cross-core / cross-lane reduce + mean done in plain JAX.
    return jnp.sum(partials) / jnp.float32(n)


if __name__ == "__main__":
    key = jax.random.PRNGKey(0)
    k1, k2 = jax.random.split(key)

    N, C = 16, 32
    x = jax.random.normal(k1, (N, C), dtype=jnp.float32)
    # soft (mixup-style) targets: rows sum to 1
    target = jax.nn.softmax(jax.random.normal(k2, (N, C), dtype=jnp.float32), axis=-1)

    loss = jax.block_until_ready(soft_target_cross_entropy(x, target))
    ref = jnp.mean(jnp.sum(-target * jax.nn.log_softmax(x, axis=-1), axis=-1))
    assert jnp.allclose(loss, ref, rtol=1e-5, atol=1e-5), (loss, ref)

    # ragged row count — exercises the in-kernel tail masking path
    N2 = 13
    x2, t2 = x[:N2], target[:N2]
    loss2 = jax.block_until_ready(soft_target_cross_entropy(x2, t2))
    ref2 = jnp.mean(jnp.sum(-t2 * jax.nn.log_softmax(x2, axis=-1), axis=-1))
    assert jnp.allclose(loss2, ref2, rtol=1e-5, atol=1e-5), (loss2, ref2)

    print("KERNEL_OK")
</pallas_src>

<mosaic_0001>
module attributes {stable_mosaic.version = 11 : i64} {
  func.func @_soft_ce_kernel(%arg0: i32, %arg1: i32, %arg2: memref<16x32xf32, #tpu.memory_space<vmem>>, %arg3: memref<16x32xf32, #tpu.memory_space<vmem>>, %arg4: memref<8x32xf32, #tpu.memory_space<vmem>>, %arg5: memref<8x32xf32, #tpu.memory_space<vmem>>) attributes {dimension_semantics = [#tpu.dimension_semantics<parallel>, #tpu.dimension_semantics<arbitrary>], iteration_bounds = array<i64: 1, 1>, scalar_prefetch = 0 : i64, scratch_operands = 1 : i64, tpu.core_type = #tpu.core_type<tc>, window_params = [{transform_indices = @transform_0, window_bounds = array<i64: 16, 32>}, {transform_indices = @transform_1, window_bounds = array<i64: 16, 32>}, {transform_indices = @transform_2, window_bounds = array<i64: 8, 32>}]} {
    %c0_i32 = arith.constant 0 : i32
    %0 = arith.cmpi eq, %arg1, %c0_i32 : i32
    %1 = arith.extui %0 : i1 to i32
    %c0_i32_0 = arith.constant 0 : i32
    %2 = arith.cmpi ne, %1, %c0_i32_0 : i32
    scf.if %2 {
      %cst_15 = arith.constant 0.000000e+00 : f32
      %39 = vector.broadcast %cst_15 : f32 to vector<8x32xf32>
      %c0_16 = arith.constant 0 : index
      %c0_17 = arith.constant 0 : index
      %40 = vector.load %arg5[%c0_16, %c0_17] : memref<8x32xf32, #tpu.memory_space<vmem>>, vector<8x32xf32>
      tpu.vector_store %arg5[%c0_16, %c0_17], %39 {strides = array<i32>} : memref<8x32xf32, #tpu.memory_space<vmem>>, vector<8x32xf32>,
    } else {
    }
    %c1_i32 = arith.constant 1 : i32
    %3 = arith.muli %arg0, %c1_i32 : i32
    %4 = arith.addi %3, %arg1 : i32
    %c16_i32 = arith.constant 16 : i32
    %5 = arith.muli %4, %c16_i32 : i32
    %c16_i32_1 = arith.constant 16 : i32
    %6 = arith.subi %c16_i32_1, %5 : i32
    %7 = tpu.iota {dimensions = array<i32: 0>} : vector<16x1xi32>
    %8 = vector.broadcast %6 : i32 to vector<16x1xi32>
    %9 = arith.cmpi slt, %7, %8 : vector<16x1xi32>
    %c0 = arith.constant 0 : index
    %c0_2 = arith.constant 0 : index
    %10 = vector.load %arg2[%c0, %c0_2] : memref<16x32xf32, #tpu.memory_space<vmem>>, vector<16x32xf32>
    %cst = arith.constant 0.000000e+00 : f32
    %11 = vector.shape_cast %9 : vector<16x1xi1> to vector<16x1xi1>
    %12 = vector.broadcast %11 : vector<16x1xi1> to vector<16x32xi1>
    %13 = vector.broadcast %cst : f32 to vector<16x32xf32>
    %14 = arith.select %12, %10, %13 : vector<16x32xi1>, vector<16x32xf32>
    %c0_3 = arith.constant 0 : index
    %c0_4 = arith.constant 0 : index
    %15 = vector.load %arg3[%c0_3, %c0_4] : memref<16x32xf32, #tpu.memory_space<vmem>>, vector<16x32xf32>
    %cst_5 = arith.constant 0.000000e+00 : f32
    %16 = vector.shape_cast %9 : vector<16x1xi1> to vector<16x1xi1>
    %17 = vector.broadcast %16 : vector<16x1xi1> to vector<16x32xi1>
    %18 = vector.broadcast %cst_5 : f32 to vector<16x32xf32>
    %19 = arith.select %17, %15, %18 : vector<16x32xi1>, vector<16x32xf32>
    %cst_6 = arith.constant dense<0xFF800000> : vector<16xf32>
    %20 = vector.multi_reduction <maximumf>, %14, %cst_6 [1] : vector<16x32xf32> to vector<16xf32>
    %21 = vector.shape_cast %20 : vector<16xf32> to vector<16x1xf32>
    %22 = vector.broadcast %21 : vector<16x1xf32> to vector<16x32xf32>
    %23 = arith.subf %14, %22 : vector<16x32xf32>
    %24 = math.exp %23 : vector<16x32xf32>
    %cst_7 = arith.constant dense<0.000000e+00> : vector<16xf32>
    %25 = vector.multi_reduction <add>, %24, %cst_7 [1] : vector<16x32xf32> to vector<16xf32>
    %26 = vector.shape_cast %25 : vector<16xf32> to vector<16x1xf32>
    %27 = math.log %26 : vector<16x1xf32>
    %28 = vector.broadcast %27 : vector<16x1xf32> to vector<16x32xf32>
    %29 = arith.subf %28, %23 : vector<16x32xf32>
    %30 = arith.mulf %19, %29 : vector<16x32xf32>
    %c0_8 = arith.constant 0 : index
    %c0_9 = arith.constant 0 : index
    %31 = vector.load %arg5[%c0_8, %c0_9] : memref<8x32xf32, #tpu.memory_space<vmem>>, vector<8x32xf32>
    %32 = vector.shape_cast %30 : vector<16x32xf32> to vector<2x8x32xf32>
    %cst_10 = arith.constant dense<0.000000e+00> : vector<8x32xf32>
    %33 = vector.multi_reduction <add>, %32, %cst_10 [0] : vector<2x8x32xf32> to vector<8x32xf32>
    %34 = arith.addf %31, %33 : vector<8x32xf32>
    %c0_11 = arith.constant 0 : index
    %c0_12 = arith.constant 0 : index
    %35 = vector.load %arg5[%c0_11, %c0_12] : memref<8x32xf32, #tpu.memory_space<vmem>>, vector<8x32xf32>
    tpu.vector_store %arg5[%c0_11, %c0_12], %34 {strides = array<i32>} : memref<8x32xf32, #tpu.memory_space<vmem>>, vector<8x32xf32>,
    %c0_i32_13 = arith.constant 0 : i32
    %36 = arith.cmpi eq, %arg1, %c0_i32_13 : i32
    %37 = arith.extui %36 : i1 to i32
    %c0_i32_14 = arith.constant 0 : i32
    %38 = arith.cmpi ne, %37, %c0_i32_14 : i32
    scf.if %38 {
      %c0_15 = arith.constant 0 : index
      %c0_16 = arith.constant 0 : index
      %39 = vector.load %arg5[%c0_15, %c0_16] : memref<8x32xf32, #tpu.memory_space<vmem>>, vector<8x32xf32>
      %c0_17 = arith.constant 0 : index
      %c0_18 = arith.constant 0 : index
      %40 = vector.load %arg4[%c0_17, %c0_18] : memref<8x32xf32, #tpu.memory_space<vmem>>, vector<8x32xf32>
      tpu.vector_store %arg4[%c0_17, %c0_18], %39 {strides = array<i32>} : memref<8x32xf32, #tpu.memory_space<vmem>>, vector<8x32xf32>,
    } else {
    }
    return
  }
  func.func @transform_0(%arg0: i32, %arg1: i32) -> (i32, i32) {
    %c1_i32 = arith.constant 1 : i32
    %0 = arith.muli %arg0, %c1_i32 : i32
    %1 = arith.addi %0, %arg1 : i32
    %c0_i32 = arith.constant 0 : i32
    %2 = arith.minsi %1, %c0_i32 : i32
    %c0_i32_0 = arith.constant 0 : i32
    %c0_i32_1 = arith.constant 0 : i32
    return %2, %c0_i32_0 : i32, i32
  }
  func.func @transform_1(%arg0: i32, %arg1: i32) -> (i32, i32) {
    %c1_i32 = arith.constant 1 : i32
    %0 = arith.muli %arg0, %c1_i32 : i32
    %1 = arith.addi %0, %arg1 : i32
    %c0_i32 = arith.constant 0 : i32
    %2 = arith.minsi %1, %c0_i32 : i32
    %c0_i32_0 = arith.constant 0 : i32
    %c0_i32_1 = arith.constant 0 : i32
    return %2, %c0_i32_0 : i32, i32
  }
  func.func @transform_2(%arg0: i32, %arg1: i32) -> (i32, i32) {
    %c0_i32 = arith.constant 0 : i32
    %c0_i32_0 = arith.constant 0 : i32
    return %arg0, %c0_i32 : i32, i32
  }
}

</mosaic_0001>

<bundles_post_ra>
// kernel: tpu_custom_call.1
= control target key start
LH: loop header
LB: loop body
LE: loop exit
PB: predicated region body
PF: predicated region fallthrough
CT: control target
= control target key end

     0   :  { %7 = vsyncpa [#allocation4], 0  ;;  %s297_s0 = inlined_call_operand.hbm [shape: f32[16,32], index: 0, kind: input, shape index: {}]   ;;  %s298_s1 = inlined_call_operand.hbm [shape: f32[16,32], index: 1, kind: input, shape index: {}]   ;;  %s299_s2 = inlined_call_operand.hbm [shape: f32[8,32], index: 2, kind: output, shape index: {}]  }
   0x1   :  { %8 = vsyncpa [#allocation7], 0 }
   0x2   :  { %9 = vsyncpa [#allocation5], 0  ;;  %s231_s9 = smov [#allocation3]   ;;  %s159_s13 = scalar_lea.hbm %s297_s0, 256 }
   0x3   :  { %s21_s10 = sshll.u32 %s231_s9, 4  ;;  %p160_p0 = scmp.ne.s32.totalorder %s297_s0, %s159_s13  ;;  %s22_s10 = int_to_ptr.vmem [resolvable:$true] %s21_s10 }
   0x4   :  { %p163_p1 = scmp.lt.u32.totalorder %s159_s13, %s297_s0 }
   0x6   :  { %p165_p2 = pnand %p163_p1, %p160_p0 }
   0x8   :  { %168 = shalt.err (!%p165_p2)
}
   0x9   :  { %s169_s18 = scalar_lea.vmem %s22_s10, 256  ;;  %p174_p4 = scmp.lt.s32.totalorder %s22_s10, %s22_s10 }
   0xa   :  { %p170_p3 = scmp.ne.s32.totalorder %s22_s10, %s169_s18  ;;  %p175_p5 = scmp.lt.s32.totalorder %s169_s18, %s169_s18 }
   0xc   :  { %p176_p6 = por %p175_p5, %p174_p4 }
   0xe   :  { %p177_p7 = pnand %p176_p6, %p170_p3 }
  0x10   :  { %180 = shalt.err (!%p177_p7)
}
  0x11   :  { %s232_s19 = smov 128   ;;  %s233_s20 = smov 8  }
  0x12   :  { %27 = dma.hbm_to_vmem [thread:$0]  %s297_s0, 256, %s22_s10, [#allocation4], %s232_s19, %s232_s19, %s233_s20  }
  0x13   :  { %s234_s23 = smov [#allocation6]   ;;  %s181_s27 = scalar_lea.hbm %s298_s1, 256 }
  0x14   :  { %s39_s24 = sshll.u32 %s234_s23, 4  ;;  %p182_p8 = scmp.ne.s32.totalorder %s298_s1, %s181_s27  ;;  %s40_s24 = int_to_ptr.vmem [resolvable:$true] %s39_s24 }
  0x15   :  { %p185_p9 = scmp.lt.u32.totalorder %s181_s27, %s298_s1 }
  0x17   :  { %p187_p10 = pnand %p185_p9, %p182_p8 }
  0x19   :  { %190 = shalt.err (!%p187_p10)
}
  0x1a   :  { %s191_s4 = scalar_lea.vmem %s40_s24, 256  ;;  %p196_p12 = scmp.lt.s32.totalorder %s40_s24, %s40_s24 }
  0x1b   :  { %p192_p11 = scmp.ne.s32.totalorder %s40_s24, %s191_s4  ;;  %p197_p13 = scmp.lt.s32.totalorder %s191_s4, %s191_s4 }
  0x1d   :  { %p198_p0 = por %p197_p13, %p196_p12 }
  0x1f   :  { %p199_p1 = pnand %p198_p0, %p192_p11 }
  0x21   :  { %202 = shalt.err (!%p199_p1)
}
  0x22   :  { %45 = dma.hbm_to_vmem [thread:$0]  %s298_s1, 256, %s40_s24, [#allocation7], %s232_s19, %s232_s19, %s233_s20  }
  0x23   :  { %225 = dma.done.wait [#allocation4], 256  }
  0x24   :  { %226 = vsyncadd [#allocation4], 4294967040 }
  0x25   :  { %227 = dma.done.wait [#allocation7], 256  }
  0x26   :  { %228 = vsyncadd [#allocation7], 4294967040  ;;  %vm64_vm0 = vcmask 261120   ;;  %v75_v0 = vld [vmem:[#allocation3] sm:$0xff]  ;;  %v76_v1 = vld [vmem:[#allocation3 + $0x8] sm:$0xff]  ;;  %v235_v14 = vmov 0.0  }
  0x27   :  { %v88_v2 = vsel %vm64_vm0, %v75_v0, -inf  ;;  %v91_v3 = vsel %vm64_vm0, %v76_v1, -inf  ;;  %65 = vst.msk [vmem:[#allocation2] sm:$0xff] %vm64_vm0, %v235_v14  ;;  %v83_v21 = vld [vmem:[#allocation6] sm:$0xff]  ;;  %v84_v23 = vld [vmem:[#allocation6 + $0x8] sm:$0xff]  ;;  %s236_s1 = smov [#allocation8]  }
  0x28   :  { %89 = vmax.xlane.f32.xlu0 %v88_v2  ;;  %s131_s6 = sshll.u32 %s236_s1, 4  ;;  %s132_s6 = int_to_ptr.vmem [resolvable:$true] %s131_s6 }
  0x29   :  { %s203_s7 = scalar_lea.vmem %s132_s6, 128  ;;  %p208_p3 = scmp.lt.s32.totalorder %s132_s6, %s132_s6 }
  0x2a   :  { %p204_p2 = scmp.ne.s32.totalorder %s132_s6, %s203_s7  ;;  %p209_p4 = scmp.lt.s32.totalorder %s203_s7, %s203_s7 }
  0x2c   :  { %92 = vmax.xlane.f32.xlu0 %v91_v3  ;;  %p210_p5 = por %p209_p4, %p208_p3 }
  0x2e   :  { %v114_v28 = vld [vmem:[#allocation2] sm:$0xff]  ;;  %p211_p6 = pnand %p210_p5, %p204_p2 }
  0xb5   :  { %v90_v4 = vpop.xlane.xlu0 %89 }
  0xb6   :  { %v94_v5 = vsub.f32 %v75_v0, %v90_v4 }
  0xb8   :  { %v96_v6 = vmul.f32 1.442695, %v94_v5 }
  0xb9   :  { %v93_v7 = vpop.xlane.xlu0 %92 }
  0xba   :  { %151 = vpow2.f32 %v96_v6  ;;  %v95_v8 = vsub.f32 %v76_v1, %v93_v7 }
  0xbc   :  { %v98_v9 = vmul.f32 1.442695, %v95_v8 }
  0xbe   :  { %153 = vpow2.f32 %v98_v9 }
  0xc4   :  { %v152_v10 = vpop.eup %151 }
  0xc5   :  { %v100_v11 = vsel %vm64_vm0, %v152_v10, 0.0 }
  0xc6   :  { %101 = vadd.xlane.f32.xlu1 %v100_v11 }
  0xc8   :  { %v154_v12 = vpop.eup %153 }
  0xc9   :  { %v103_v13 = vsel %vm64_vm0, %v154_v12, 0.0 }
  0xca   :  { %104 = vadd.xlane.f32.xlu1 %v103_v13 }
 0x153   :  { %v102_v15 = vpop.xlane.xlu1 %101 }
 0x154   :  { %155 = vlog2.f32 %v102_v15 }
 0x157   :  { %v105_v16 = vpop.xlane.xlu1 %104 }
 0x158   :  { %157 = vlog2.f32 %v105_v16 }
 0x15e   :  { %v156_v17 = vpop.eup %155 }
 0x15f   :  { %v107_v18 = vmul.f32 0.6931472, %v156_v17 }
 0x161   :  { %v110_v19 = vsub.f32 %v107_v18, %v94_v5 }
 0x162   :  { %v158_v20 = vpop.eup %157 }
 0x163   :  { %v109_v22 = vmul.f32 0.6931472, %v158_v20  ;;  %v112_v24 = vmul.f32 %v110_v19, %v83_v21 }
 0x165   :  { %v111_v25 = vsub.f32 %v109_v22, %v95_v8  ;;  %v115_v27 = vsel %vm64_vm0, %v112_v24, 0.0 }
 0x167   :  { %v113_v26 = vmul.f32 %v111_v25, %v84_v23 }
 0x169   :  { %v116_v29 = vsel %vm64_vm0, %v113_v26, 0.0 }
 0x16a   :  { %v117_v30 = vadd.f32 %v116_v29, %v115_v27 }
 0x16c   :  { %v118_v31 = vadd.f32 %v117_v30, %v114_v28 }
 0x16e   :  { %119 = vst.msk [vmem:[#allocation2] sm:$0xff] %vm64_vm0, %v118_v31 }
 0x175   :  { %v123_v32 = vld [vmem:[#allocation2] sm:$0xff] }
 0x176   :  { %124 = vst.msk [vmem:[#allocation8] sm:$0xff] %vm64_vm0, %v123_v32 }
 0x177   :  { %214 = shalt.err (!%p211_p6)
}
 0x178   :  { %s215_s10 = scalar_lea.hbm %s299_s2, 128 }
 0x179   :  { %p216_p7 = scmp.ne.s32.totalorder %s299_s2, %s215_s10  ;;  %p219_p8 = scmp.lt.u32.totalorder %s215_s10, %s299_s2 }
 0x17b   :  { %p221_p9 = pnand %p219_p8, %p216_p7 }
 0x17d   :  { %224 = shalt.err (!%p221_p9)
}
 0x17e   :  { %134 = dma.vmem_to_hbm [thread:$0]  %s132_s6, 128, %s299_s2, [#allocation5]  }
 0x17f   :  { %229 = dma.done.wait [#allocation5], 128  }
 0x180   :  { %230 = vsyncadd [#allocation5], 4294967168 }
 0x181   :  { %138 = vsyncpa [#allocation4], 1 }
 0x182   :  { %139 = vsyncpa [#allocation7], 1 }
 0x183   :  { %140 = vsyncpa [#allocation5], 1 }

</bundles_post_ra>
